<compile_context>
chip_gen: v7x
topology: tpu7x:2x2x1
jax: 0.10.0
libtpu: 0.0.40
codegen_flags: <defaults>
</compile_context>

<pallas_src>
import jax
import jax.numpy as jnp
from jax.experimental import pallas as pl
from jax.experimental.pallas import tpu as pltpu


def _round_up(x: int, m: int) -> int:
    return ((x + m - 1) // m) * m


def _mf_kernel(u_idx_ref, i_idx_ref, u_tabT_ref, i_tabT_ref, o_ref):
    # u_idx_ref, i_idx_ref : (1, TB) int32            batch tile of lookup indices
    # u_tabT_ref           : (F_pad, n_users_pad) f32  VMEM-resident (factors on sublanes)
    # i_tabT_ref           : (F_pad, n_items_pad) f32  VMEM-resident
    # o_ref                : (1, TB) f32               lane-dense output tile
    n_users_pad = u_tabT_ref.shape[1]
    n_items_pad = i_tabT_ref.shape[1]
    tb = u_idx_ref.shape[1]

    # One-hot selection matrices: rows on sublanes, batch on lanes.
    #   oh[r, b] = (idx[b] == r)
    u_oh = (jax.lax.broadcasted_iota(jnp.int32, (n_users_pad, tb), 0)
            == u_idx_ref[...]).astype(jnp.float32)
    i_oh = (jax.lax.broadcasted_iota(jnp.int32, (n_items_pad, tb), 0)
            == i_idx_ref[...]).astype(jnp.float32)

    # MXU one-hot gather: (F_pad, n_rows_pad) @ (n_rows_pad, TB) -> (F_pad, TB).
    u_g = jnp.dot(u_tabT_ref[...], u_oh, preferred_element_type=jnp.float32)
    i_g = jnp.dot(i_tabT_ref[...], i_oh, preferred_element_type=jnp.float32)

    # Elementwise multiply + reduce over the factor (sublane) axis -> (1, TB).
    o_ref[...] = jnp.sum(u_g * i_g, axis=0, keepdims=True)


def matrix_factorization_forward(user, item, user_factors, item_factors,
                                 *, batch_tile=512):
    """Pallas equivalent of MatrixFactorization.forward.

    user, item:   integer index vectors of shape (B,)
    user_factors: (n_users, n_factors) float32
    item_factors: (n_items, n_factors) float32
    returns:      (B,) float32
    """
    assert user.shape == item.shape
    B = user.shape[0]
    n_users, n_factors = user_factors.shape
    n_items, n_factors_i = item_factors.shape
    assert n_factors_i == n_factors

    # --- TPU-friendly padding -------------------------------------------
    # Factor axis lives on SUBLANES of tableT -> 8-alignment suffices (150->152).
    f_pad = _round_up(n_factors, 8)
    # Row axis lives on LANES (and is the MXU K dim) -> pad to 128.
    nu_pad = _round_up(n_users, 128)
    ni_pad = _round_up(n_items, 128)
    # Lane-dense batch tile: always a multiple of 128, capped at batch_tile.
    tb = _round_up(min(max(batch_tile, 1), _round_up(max(B, 1), 128)), 128)
    b_pad = _round_up(B, tb)
    n_tiles = b_pad // tb

    # Tables: zero-pad, transpose so factors sit on sublanes and rows on lanes.
    # TODO(synk): optional bf16 table storage (2x MXU throughput, half VMEM) if
    # reduced factor precision is acceptable; kept f32 here for exactness.
    u_tabT = jnp.zeros((f_pad, nu_pad), jnp.float32).at[:n_factors, :n_users].set(
        user_factors.astype(jnp.float32).T)
    i_tabT = jnp.zeros((f_pad, ni_pad), jnp.float32).at[:n_factors, :n_items].set(
        item_factors.astype(jnp.float32).T)

    # Indices: pad (with row 0) to a whole number of tiles; (n_tiles, TB) layout.
    u_idx = jnp.zeros((b_pad,), jnp.int32).at[:B].set(user.astype(jnp.int32))
    i_idx = jnp.zeros((b_pad,), jnp.int32).at[:B].set(item.astype(jnp.int32))
    u_idx = u_idx.reshape(n_tiles, tb)
    i_idx = i_idx.reshape(n_tiles, tb)

    # --- VMEM budget (explicit, instead of the 16/32 MiB scoped default) ---
    table_bytes = 4 * f_pad * (nu_pad + ni_pad)          # resident tables
    onehot_bytes = 4 * tb * (nu_pad + ni_pad)            # in-kernel one-hot temps
    gather_bytes = 4 * 2 * f_pad * tb                    # (F_pad, TB) gather temps
    io_bytes = 4 * 2 * (3 * tb)                          # double-buffered idx/out tiles
    vmem_needed = 2 * table_bytes + 2 * (onehot_bytes + gather_bytes) + io_bytes
    vmem_limit = int(min(max(vmem_needed + (4 << 20), 16 << 20), 64 << 20))

    def _call(table_spec_kwargs):
        grid_spec = pltpu.PrefetchScalarGridSpec(
            num_scalar_prefetch=0,
            grid=(n_tiles,),
            in_specs=[
                pl.BlockSpec((1, tb), lambda t: (t, 0)),          # user index tile
                pl.BlockSpec((1, tb), lambda t: (t, 0)),          # item index tile
                pl.BlockSpec((f_pad, nu_pad), lambda t: (0, 0),   # resident user table^T
                             **table_spec_kwargs),
                pl.BlockSpec((f_pad, ni_pad), lambda t: (0, 0),   # resident item table^T
                             **table_spec_kwargs),
            ],
            out_specs=pl.BlockSpec((1, tb), lambda t: (t, 0)),
        )
        return pl.pallas_call(
            _mf_kernel,
            out_shape=jax.ShapeDtypeStruct((n_tiles, tb), jnp.float32),
            grid_spec=grid_spec,
            compiler_params=pltpu.CompilerParams(
                dimension_semantics=("parallel",),
                vmem_limit_bytes=vmem_limit,
            ),
        )(u_idx, i_idx, u_tabT, i_tabT)

    try:
        # Constant index_map -> tables are fetched once; Buffered(1) drops the
        # second (never used) pipeline buffer, halving resident-table VMEM.
        out = _call({"pipeline_mode": pl.Buffered(1)})
    except Exception:
        # Fallback for jax builds where the TPU pallas_call pipeline rejects
        # single-buffered BlockSpecs: identical numerics, 2x table VMEM.
        out = _call({})

    return out.reshape(-1)[:B]


if __name__ == "__main__":
    # Small, deterministic problem consistent with the module's __init__.
    n_users, n_items, n_factors = 32, 48, 150
    batch = 8

    key = jax.random.PRNGKey(0)
    k_uw, k_iw, k_u, k_i = jax.random.split(key, 4)

    # nn.Embedding default init ~ N(0, 1).
    user_factors = jax.random.normal(k_uw, (n_users, n_factors), dtype=jnp.float32)
    item_factors = jax.random.normal(k_iw, (n_items, n_factors), dtype=jnp.float32)

    user = jax.random.randint(k_u, (batch,), 0, n_users, dtype=jnp.int32)
    item = jax.random.randint(k_i, (batch,), 0, n_items, dtype=jnp.int32)

    out = matrix_factorization_forward(user, item, user_factors, item_factors)
    out = jax.block_until_ready(out)

    # Pure-JAX reference check of forward semantics.
    ref = jnp.sum(user_factors[user] * item_factors[item], axis=1)
    assert out.shape == (batch,)
    assert jnp.allclose(out, ref, atol=1e-4, rtol=1e-4), (out, ref)

    print("KERNEL_OK")
</pallas_src>

<mosaic_0001>
module attributes {stable_mosaic.version = 11 : i64} {
  func.func @_mf_kernel(%arg0: i32, %arg1: memref<1x128xi32, #tpu.memory_space<vmem>>, %arg2: memref<1x128xi32, #tpu.memory_space<vmem>>, %arg3: memref<152x128xf32, #tpu.memory_space<vmem>>, %arg4: memref<152x128xf32, #tpu.memory_space<vmem>>, %arg5: memref<1x128xf32, #tpu.memory_space<vmem>>) attributes {dimension_semantics = [#tpu.dimension_semantics<parallel>], iteration_bounds = array<i64: 1>, scalar_prefetch = 0 : i64, scratch_operands = 0 : i64, tpu.core_type = #tpu.core_type<tc>, window_params = [{transform_indices = @transform_0, window_bounds = array<i64: 1, 128>}, {transform_indices = @transform_1, window_bounds = array<i64: 1, 128>}, {pipeline_mode = #tpu.pipeline_mode<synchronous>, transform_indices = @transform_2, window_bounds = array<i64: 152, 128>}, {pipeline_mode = #tpu.pipeline_mode<synchronous>, transform_indices = @transform_3, window_bounds = array<i64: 152, 128>}, {transform_indices = @transform_4, window_bounds = array<i64: 1, 128>}]} {
    %0 = tpu.iota {dimensions = array<i32: 0>} : vector<128x128xi32>
    %c0 = arith.constant 0 : index
    %c0_0 = arith.constant 0 : index
    %1 = vector.load %arg1[%c0, %c0_0] : memref<1x128xi32, #tpu.memory_space<vmem>>, vector<1x128xi32>
    %2 = vector.broadcast %1 : vector<1x128xi32> to vector<128x128xi32>
    %3 = arith.cmpi eq, %0, %2 : vector<128x128xi32>
    %4 = arith.extui %3 : vector<128x128xi1> to vector<128x128xi32>
    %5 = arith.sitofp %4 : vector<128x128xi32> to vector<128x128xf32>
    %6 = tpu.iota {dimensions = array<i32: 0>} : vector<128x128xi32>
    %c0_1 = arith.constant 0 : index
    %c0_2 = arith.constant 0 : index
    %7 = vector.load %arg2[%c0_1, %c0_2] : memref<1x128xi32, #tpu.memory_space<vmem>>, vector<1x128xi32>
    %8 = vector.broadcast %7 : vector<1x128xi32> to vector<128x128xi32>
    %9 = arith.cmpi eq, %6, %8 : vector<128x128xi32>
    %10 = arith.extui %9 : vector<128x128xi1> to vector<128x128xi32>
    %11 = arith.sitofp %10 : vector<128x128xi32> to vector<128x128xf32>
    %c0_3 = arith.constant 0 : index
    %c0_4 = arith.constant 0 : index
    %12 = vector.load %arg3[%c0_3, %c0_4] : memref<152x128xf32, #tpu.memory_space<vmem>>, vector<152x128xf32>
    %cst = arith.constant dense<0.000000e+00> : vector<152x128xf32>
    %13 = tpu.matmul %12, %5, %cst {dimension_numbers = #tpu.dot_dimension_numbers<[1], [0], [0], [1], [0, 0, 1, 1], [], []>} : vector<152x128xf32>, vector<128x128xf32>, vector<152x128xf32> -> vector<152x128xf32>
    %c0_5 = arith.constant 0 : index
    %c0_6 = arith.constant 0 : index
    %14 = vector.load %arg4[%c0_5, %c0_6] : memref<152x128xf32, #tpu.memory_space<vmem>>, vector<152x128xf32>
    %cst_7 = arith.constant dense<0.000000e+00> : vector<152x128xf32>
    %15 = tpu.matmul %14, %11, %cst_7 {dimension_numbers = #tpu.dot_dimension_numbers<[1], [0], [0], [1], [0, 0, 1, 1], [], []>} : vector<152x128xf32>, vector<128x128xf32>, vector<152x128xf32> -> vector<152x128xf32>
    %16 = arith.mulf %13, %15 : vector<152x128xf32>
    %cst_8 = arith.constant dense<0.000000e+00> : vector<128xf32>
    %17 = vector.multi_reduction <add>, %16, %cst_8 [0] : vector<152x128xf32> to vector<128xf32>
    %18 = vector.shape_cast %17 : vector<128xf32> to vector<1x128xf32>
    %c0_9 = arith.constant 0 : index
    %c0_10 = arith.constant 0 : index
    %19 = vector.load %arg5[%c0_9, %c0_10] : memref<1x128xf32, #tpu.memory_space<vmem>>, vector<1x128xf32>
    tpu.vector_store %arg5[%c0_9, %c0_10], %18 {strides = array<i32>} : memref<1x128xf32, #tpu.memory_space<vmem>>, vector<1x128xf32>,
    return
  }
  func.func @transform_0(%arg0: i32) -> (i32, i32) {
    %c0_i32 = arith.constant 0 : i32
    %c0_i32_0 = arith.constant 0 : i32
    return %arg0, %c0_i32 : i32, i32
  }
  func.func @transform_1(%arg0: i32) -> (i32, i32) {
    %c0_i32 = arith.constant 0 : i32
    %c0_i32_0 = arith.constant 0 : i32
    return %arg0, %c0_i32 : i32, i32
  }
  func.func @transform_2(%arg0: i32) -> (i32, i32) {
    %c0_i32 = arith.constant 0 : i32
    %c0_i32_0 = arith.constant 0 : i32
    %c0_i32_1 = arith.constant 0 : i32
    return %c0_i32, %c0_i32_0 : i32, i32
  }
  func.func @transform_3(%arg0: i32) -> (i32, i32) {
    %c0_i32 = arith.constant 0 : i32
    %c0_i32_0 = arith.constant 0 : i32
    %c0_i32_1 = arith.constant 0 : i32
    return %c0_i32, %c0_i32_0 : i32, i32
  }
  func.func @transform_4(%arg0: i32) -> (i32, i32) {
    %c0_i32 = arith.constant 0 : i32
    %c0_i32_0 = arith.constant 0 : i32
    return %arg0, %c0_i32 : i32, i32
  }
}

module attributes {stable_mosaic.version = 11 : i64} {
  func.func @_mf_kernel(%arg0: i32, %arg1: memref<1x128xi32, #tpu.memory_space<vmem>>, %arg2: memref<1x128xi32, #tpu.memory_space<vmem>>, %arg3: memref<152x128xf32, #tpu.memory_space<vmem>>, %arg4: memref<152x128xf32, #tpu.memory_space<vmem>>, %arg5: memref<1x128xf32, #tpu.memory_space<vmem>>) attributes {dimension_semantics = [#tpu.dimension_semantics<parallel>], iteration_bounds = array<i64: 1>, scalar_prefetch = 0 : i64, scratch_operands = 0 : i64, tpu.core_type = #tpu.core_type<tc>, window_params = [{transform_indices = @transform_0, window_bounds = array<i64: 1, 128>}, {transform_indices = @transform_1, window_bounds = array<i64: 1, 128>}, {pipeline_mode = #tpu.pipeline_mode<synchronous>, transform_indices = @transform_2, window_bounds = array<i64: 152, 128>}, {pipeline_mode = #tpu.pipeline_mode<synchronous>, transform_indices = @transform_3, window_bounds = array<i64: 152, 128>}, {transform_indices = @transform_4, window_bounds = array<i64: 1, 128>}]} {
    %0 = tpu.iota {dimensions = array<i32: 0>} : vector<128x128xi32>
    %c0 = arith.constant 0 : index
    %c0_0 = arith.constant 0 : index
    %1 = vector.load %arg1[%c0, %c0_0] : memref<1x128xi32, #tpu.memory_space<vmem>>, vector<1x128xi32>
    %2 = vector.broadcast %1 : vector<1x128xi32> to vector<128x128xi32>
    %3 = arith.cmpi eq, %0, %2 : vector<128x128xi32>
    %4 = arith.extui %3 : vector<128x128xi1> to vector<128x128xi32>
    %5 = arith.sitofp %4 : vector<128x128xi32> to vector<128x128xf32>
    %6 = tpu.iota {dimensions = array<i32: 0>} : vector<128x128xi32>
    %c0_1 = arith.constant 0 : index
    %c0_2 = arith.constant 0 : index
    %7 = vector.load %arg2[%c0_1, %c0_2] : memref<1x128xi32, #tpu.memory_space<vmem>>, vector<1x128xi32>
    %8 = vector.broadcast %7 : vector<1x128xi32> to vector<128x128xi32>
    %9 = arith.cmpi eq, %6, %8 : vector<128x128xi32>
    %10 = arith.extui %9 : vector<128x128xi1> to vector<128x128xi32>
    %11 = arith.sitofp %10 : vector<128x128xi32> to vector<128x128xf32>
    %c0_3 = arith.constant 0 : index
    %c0_4 = arith.constant 0 : index
    %12 = vector.load %arg3[%c0_3, %c0_4] : memref<152x128xf32, #tpu.memory_space<vmem>>, vector<152x128xf32>
    %cst = arith.constant dense<0.000000e+00> : vector<152x128xf32>
    %13 = tpu.matmul %12, %5, %cst {dimension_numbers = #tpu.dot_dimension_numbers<[1], [0], [0], [1], [0, 0, 1, 1], [], []>} : vector<152x128xf32>, vector<128x128xf32>, vector<152x128xf32> -> vector<152x128xf32>
    %c0_5 = arith.constant 0 : index
    %c0_6 = arith.constant 0 : index
    %14 = vector.load %arg4[%c0_5, %c0_6] : memref<152x128xf32, #tpu.memory_space<vmem>>, vector<152x128xf32>
    %cst_7 = arith.constant dense<0.000000e+00> : vector<152x128xf32>
    %15 = tpu.matmul %14, %11, %cst_7 {dimension_numbers = #tpu.dot_dimension_numbers<[1], [0], [0], [1], [0, 0, 1, 1], [], []>} : vector<152x128xf32>, vector<128x128xf32>, vector<152x128xf32> -> vector<152x128xf32>
    %16 = arith.mulf %13, %15 : vector<152x128xf32>
    %cst_8 = arith.constant dense<0.000000e+00> : vector<128xf32>
    %17 = vector.multi_reduction <add>, %16, %cst_8 [0] : vector<152x128xf32> to vector<128xf32>
    %18 = vector.shape_cast %17 : vector<128xf32> to vector<1x128xf32>
    %c0_9 = arith.constant 0 : index
    %c0_10 = arith.constant 0 : index
    %19 = vector.load %arg5[%c0_9, %c0_10] : memref<1x128xf32, #tpu.memory_space<vmem>>, vector<1x128xf32>
    tpu.vector_store %arg5[%c0_9, %c0_10], %18 {strides = array<i32>} : memref<1x128xf32, #tpu.memory_space<vmem>>, vector<1x128xf32>,
    return
  }
  func.func @transform_0(%arg0: i32) -> (i32, i32) {
    %c0_i32 = arith.constant 0 : i32
    %c0_i32_0 = arith.constant 0 : i32
    return %arg0, %c0_i32 : i32, i32
  }
  func.func @transform_1(%arg0: i32) -> (i32, i32) {
    %c0_i32 = arith.constant 0 : i32
    %c0_i32_0 = arith.constant 0 : i32
    return %arg0, %c0_i32 : i32, i32
  }
  func.func @transform_2(%arg0: i32) -> (i32, i32) {
    %c0_i32 = arith.constant 0 : i32
    %c0_i32_0 = arith.constant 0 : i32
    %c0_i32_1 = arith.constant 0 : i32
    return %c0_i32, %c0_i32_0 : i32, i32
  }
  func.func @transform_3(%arg0: i32) -> (i32, i32) {
    %c0_i32 = arith.constant 0 : i32
    %c0_i32_0 = arith.constant 0 : i32
    %c0_i32_1 = arith.constant 0 : i32
    return %c0_i32, %c0_i32_0 : i32, i32
  }
  func.func @transform_4(%arg0: i32) -> (i32, i32) {
    %c0_i32 = arith.constant 0 : i32
    %c0_i32_0 = arith.constant 0 : i32
    return %arg0, %c0_i32 : i32, i32
  }
}

</mosaic_0001>

<bundles_post_ra>
// kernel: tpu_custom_call.1
= control target key start
LH: loop header
LB: loop body
LE: loop exit
PB: predicated region body
PF: predicated region fallthrough
CT: control target
= control target key end

     0   :  { %9 = vsyncpa [#allocation3], 0  ;;  %s1319_s0 = inlined_call_operand.hbm [shape: s32[1,128], index: 0, kind: input, shape index: {}]   ;;  %s1320_s1 = inlined_call_operand.vmem [shape: s32[1,128], index: 1, kind: input, shape index: {}]   ;;  %s1321_s2 = inlined_call_operand.hbm [shape: f32[152,128], index: 2, kind: input, shape index: {}]   ;;  %s1322_s3 = inlined_call_operand.hbm [shape: f32[152,128], index: 3, kind: input, shape index: {}]   ;;  %s1323_s4 = inlined_call_operand.hbm [shape: f32[1,128], index: 4, kind: output, shape index: {}]  }
   0x1   :  { %10 = vsyncpa [#allocation6], 0 }
   0x2   :  { %11 = vsyncpa [#allocation4], 0  ;;  %s1064_s15 = smov [#allocation5]   ;;  %s970_s19 = scalar_lea.hbm %s1321_s2, 2432 }
   0x3   :  { %s29_s16 = sshll.u32 %s1064_s15, 4  ;;  %p971_p0 = scmp.ne.s32.totalorder %s1321_s2, %s970_s19  ;;  %s30_s16 = int_to_ptr.vmem [resolvable:$true] %s29_s16 }
   0x4   :  { %p974_p1 = scmp.lt.u32.totalorder %s970_s19, %s1321_s2 }
   0x6   :  { %p976_p2 = pnand %p974_p1, %p971_p0 }
   0x8   :  { %979 = shalt.err (!%p976_p2)
}
   0x9   :  { %s980_s24 = scalar_lea.vmem %s30_s16, 2432  ;;  %p985_p4 = scmp.lt.s32.totalorder %s30_s16, %s30_s16 }
   0xa   :  { %p981_p3 = scmp.ne.s32.totalorder %s30_s16, %s980_s24  ;;  %p986_p5 = scmp.lt.s32.totalorder %s980_s24, %s980_s24 }
   0xc   :  { %p987_p6 = por %p986_p5, %p985_p4 }
   0xe   :  { %p988_p7 = pnand %p987_p6, %p981_p3 }
  0x10   :  { %991 = shalt.err (!%p988_p7)
}
  0x11   :  { %s1065_s25 = smov 128   ;;  %s1066_s26 = smov 8  }
  0x12   :  { %35 = dma.hbm_to_vmem [thread:$0]  %s1321_s2, 2432, %s30_s16, [#allocation6], %s1065_s25, %s1065_s25, %s1066_s26  }
  0x13   :  { %s1067_s29 = smov [#allocation2]   ;;  %s1068_s5 = smov [#allocation7]  }
  0x14   :  { %s18_s30 = sshll.u32 %s1067_s29, 4  ;;  %s41_s6 = sshll.u32 %s1068_s5, 4  ;;  %s19_s30 = int_to_ptr.vmem [resolvable:$true] %s18_s30  ;;  %s42_s6 = int_to_ptr.vmem [resolvable:$true] %s41_s6 }
  0x15   :  { %s992_s9 = scalar_lea.hbm %s1319_s0, 16 }
  0x16   :  { %p993_p8 = scmp.ne.s32.totalorder %s1319_s0, %s992_s9  ;;  %p996_p9 = scmp.lt.u32.totalorder %s992_s9, %s1319_s0 }
  0x18   :  { %p998_p10 = pnand %p996_p9, %p993_p8 }
  0x1a   :  { %1001 = shalt.err (!%p998_p10)
}
  0x1b   :  { %s1002_s2 = scalar_lea.vmem %s19_s30, 16  ;;  %s1006_s14 = scalar_lea.vmem %s19_s30, 32 }
  0x1c   :  { %p1003_p11 = scmp.ne.s32.totalorder %s19_s30, %s1002_s2  ;;  %p1007_p12 = scmp.lt.s32.totalorder %s19_s30, %s19_s30 }
  0x1d   :  { %p1008_p13 = scmp.lt.s32.totalorder %s1006_s14, %s1002_s2 }
  0x1f   :  { %p1009_p0 = por %p1008_p13, %p1007_p12 }
  0x21   :  { %p1010_p1 = pnand %p1009_p0, %p1003_p11 }
  0x23   :  { %1013 = shalt.err (!%p1010_p1)
}
  0x24   :  { %21 = dma.hbm_to_vmem [thread:$0]  %s1319_s0, 16, %s19_s30, [#allocation3]  }
  0x25   :  { %s1014_s19 = scalar_lea.hbm %s1322_s3, 2432 }
  0x26   :  { %p1015_p2 = scmp.ne.s32.totalorder %s1322_s3, %s1014_s19  ;;  %p1018_p3 = scmp.lt.u32.totalorder %s1014_s19, %s1322_s3 }
  0x28   :  { %p1020_p4 = pnand %p1018_p3, %p1015_p2 }
  0x2a   :  { %1023 = shalt.err (!%p1020_p4)
}
  0x2b   :  { %s1024_s24 = scalar_lea.vmem %s42_s6, 2432  ;;  %p1029_p6 = scmp.lt.s32.totalorder %s42_s6, %s42_s6 }
  0x2c   :  { %p1025_p5 = scmp.ne.s32.totalorder %s42_s6, %s1024_s24  ;;  %p1030_p7 = scmp.lt.s32.totalorder %s1024_s24, %s1024_s24 }
  0x2e   :  { %p1031_p8 = por %p1030_p7, %p1029_p6 }
  0x30   :  { %p1032_p9 = pnand %p1031_p8, %p1025_p5 }
  0x32   :  { %1035 = shalt.err (!%p1032_p9)
}
  0x33   :  { %47 = dma.hbm_to_vmem [thread:$0]  %s1322_s3, 2432, %s42_s6, [#allocation6], %s1065_s25, %s1065_s25, %s1066_s26  }
  0x34   :  { %1058 = dma.done.wait [#allocation3], 16  }
  0x35   :  { %1059 = vsyncadd [#allocation3], 4294967280 }
  0x36   :  { %1060 = dma.done.wait [#allocation6], 4864  }
  0x37   :  { %1061 = vsyncadd [#allocation6], 4294962432  ;;  %v57_v0 = vlaneseq  ;;  %v1069_v1 = vmov 0.0|0.0   ;;  %vm1070_vm0 = vmmov 0   ;;  %v1071_v3 = vmov 0.0   ;;  %v180_v22 = vld [vmem:[#allocation5] sm:$0xff] }
  0x38   :  { %912 = vmatprep.subr.bf16.mxu0 %v1069_v1  ;;  %936 = vmatprep.subr.bf16.mxu1 %v1069_v1  ;;  %v1152_v7 = vld [vmem:[#allocation2] ss:$0 sm:$0xff]  ;;  %v1072_v11 = vmov 1.0|1.0   ;;  %v181_v24 = vld [vmem:[#allocation5 + $0x8] sm:$0xff]  ;;  %v360_v25 = vld [vmem:[#allocation7 + $0x8] sm:$0xff] }
  0x39   :  { %v1143_v2 = vshrl.u32 %v57_v0, 7  ;;  %766 = vmatprep.mubr.msk.f32.mxu0 %vm1070_vm0, %v1071_v3  ;;  %855 = vmatprep.mubr.msk.f32.mxu1 %vm1070_vm0, %v1071_v3  ;;  %v1157_v8 = vld [vmem:[%s1320_s1] ss:$0 sm:$0xff]  ;;  %v182_v26 = vld [vmem:[#allocation5 + $0x10] sm:$0xff]  ;;  %v361_v27 = vld [vmem:[#allocation7 + $0x10] sm:$0xff]  ;;  %s1073_s1 = smov [#allocation8]  }
  0x3a   :  { %v359_v23 = vld [vmem:[#allocation7] sm:$0xff]  ;;  %v362_v29 = vld [vmem:[#allocation7 + $0x18] sm:$0xff]  ;;  %v184_v30 = vld [vmem:[#allocation5 + $0x20] sm:$0xff]  ;;  %s588_s26 = sshll.u32 %s1073_s1, 4  ;;  %s589_s26 = int_to_ptr.vmem [resolvable:$true] %s588_s26 }
  0x3b   :  { %v59_v4 = vadd.s32 8, %v1143_v2  ;;  %v60_v5 = vadd.s32 16, %v1143_v2  ;;  %v61_v6 = vadd.s32 24, %v1143_v2  ;;  %v62_v9 = vadd.s32 32, %v1143_v2  ;;  %v183_v28 = vld [vmem:[#allocation5 + $0x18] sm:$0xff]  ;;  %v185_v32 = vld [vmem:[#allocation5 + $0x28] sm:$0xff]  ;;  %p1041_p11 = scmp.lt.s32.totalorder %s589_s26, %s589_s26 }
  0x3c   :  { %v63_v10 = vadd.s32 40, %v1143_v2  ;;  %vm79_vm1 = vcmp.eq.s32.totalorder %v1143_v2, %v1152_v7  ;;  %vm132_vm3 = vcmp.eq.s32.totalorder %v1143_v2, %v1157_v8  ;;  %v64_v12 = vadd.s32 48, %v1143_v2  ;;  %v363_v31 = vld [vmem:[#allocation7 + $0x20] sm:$0xff]  ;;  %v364_v33 = vld [vmem:[#allocation7 + $0x28] sm:$0xff]  ;;  %v186_v34 = vld [vmem:[#allocation5 + $0x30] sm:$0xff]  ;;  %s1036_s28 = scalar_lea.vmem %s589_s26, 16 }
  0x3d   :  { %vm80_vm2 = vcmp.eq.s32.totalorder %v59_v4, %v1152_v7  ;;  %vm133_vm4 = vcmp.eq.s32.totalorder %v59_v4, %v1157_v8  ;;  %vm81_vm6 = vcmp.eq.s32.totalorder %v60_v5, %v1152_v7  ;;  %vm82_vm7 = vcmp.eq.s32.totalorder %v61_v6, %v1152_v7  ;;  %v365_v35 = vld [vmem:[#allocation7 + $0x30] sm:$0xff]  ;;  %v187_v36 = vld [vmem:[#allocation5 + $0x38] sm:$0xff]  ;;  %v366_v37 = vld [vmem:[#allocation7 + $0x38] sm:$0xff]  ;;  %p1037_p10 = scmp.ne.s32.totalorder %s589_s26, %s1036_s28  ;;  %s1040_s29 = scalar_lea.vmem %s589_s26, 32 }
  0x3e   :  { %vm913_vm5 = vmpackc.low %vm80_vm2, %vm79_vm1  ;;  %vm134_vm8 = vcmp.eq.s32.totalorder %v60_v5, %v1157_v8  ;;  %vm135_vm9 = vcmp.eq.s32.totalorder %v61_v6, %v1157_v8  ;;  %vm83_vm13 = vcmp.eq.s32.totalorder %v62_v9, %v1152_v7  ;;  %vm84_vm14 = vcmp.eq.s32.totalorder %v63_v10, %v1152_v7  ;;  %v188_v38 = vld [vmem:[#allocation5 + $0x40] sm:$0xff]  ;;  %v367_v39 = vld [vmem:[#allocation7 + $0x40] sm:$0xff]  ;;  %p1042_p12 = scmp.lt.s32.totalorder %s1040_s29, %s1036_s28 }
  0x3f   :  { %914 = vmatpush3.bf16.msk.msra.mxu0 %vm913_vm5, %v1072_v11  ;;  %vm937_vm10 = vmpackc.low %vm133_vm4, %vm132_vm3  ;;  %v65_v13 = vadd.s32 56, %v1143_v2  ;;  %vm136_vm15 = vcmp.eq.s32.totalorder %v62_v9, %v1157_v8  ;;  %vm137_vm1 = vcmp.eq.s32.totalorder %v63_v10, %v1157_v8  ;;  %vm85_vm4 = vcmp.eq.s32.totalorder %v64_v12, %v1152_v7  ;;  %v189_v40 = vld [vmem:[#allocation5 + $0x48] sm:$0xff]  ;;  %v368_v41 = vld [vmem:[#allocation7 + $0x48] sm:$0xff] }
  0x40   :  { %938 = vmatpush3.bf16.msk.msra.mxu1 %vm937_vm10, %v1072_v11  ;;  %915 = vmatprep.subr.bf16.mxu0 %v1069_v1  ;;  %vm916_vm11 = vmpackc.low %vm82_vm7, %vm81_vm6  ;;  %v66_v14 = vadd.s32 64, %v1143_v2  ;;  %v67_v15 = vadd.s32 72, %v1143_v2  ;;  %vm138_vm6 = vcmp.eq.s32.totalorder %v64_v12, %v1157_v8  ;;  %v68_v16 = vadd.s32 80, %v1143_v2  ;;  %v190_v42 = vld [vmem:[#allocation5 + $0x50] sm:$0xff]  ;;  %v369_v43 = vld [vmem:[#allocation7 + $0x50] sm:$0xff]  ;;  %p1043_p13 = por %p1042_p12, %p1041_p11 }
  0x41   :  { %939 = vmatprep.subr.bf16.mxu1 %v1069_v1  ;;  %vm940_vm12 = vmpackc.low %vm135_vm9, %vm134_vm8  ;;  %vm86_vm5 = vcmp.eq.s32.totalorder %v65_v13, %v1152_v7  ;;  %vm139_vm7 = vcmp.eq.s32.totalorder %v65_v13, %v1157_v8  ;;  %v69_v17 = vadd.s32 88, %v1143_v2  ;;  %v70_v18 = vadd.s32 96, %v1143_v2  ;;  %v191_v44 = vld [vmem:[#allocation5 + $0x58] sm:$0xff]  ;;  %v370_v45 = vld [vmem:[#allocation7 + $0x58] sm:$0xff] }
  0x42   :  { %vm919_vm2 = vmpackc.low %vm84_vm14, %vm83_vm13  ;;  %vm87_vm10 = vcmp.eq.s32.totalorder %v66_v14, %v1152_v7  ;;  %vm141_vm13 = vcmp.eq.s32.totalorder %v67_v15, %v1157_v8  ;;  %v71_v19 = vadd.s32 104, %v1143_v2  ;;  %v72_v20 = vadd.s32 112, %v1143_v2  ;;  %v192_v46 = vld [vmem:[#allocation5 + $0x60] sm:$0xff]  ;;  %v371_v47 = vld [vmem:[#allocation7 + $0x60] sm:$0xff]  ;;  %p1044_p0 = pnand %p1043_p13, %p1037_p10 }
  0x43   :  { %917 = vmatpush3.bf16.msk.msra.mxu0 %vm916_vm11, %v1072_v11  ;;  %vm943_vm3 = vmpackc.low %vm137_vm1, %vm136_vm15  ;;  %vm88_vm11 = vcmp.eq.s32.totalorder %v67_v15, %v1152_v7  ;;  %vm89_vm1 = vcmp.eq.s32.totalorder %v68_v16, %v1152_v7  ;;  %v73_v21 = vadd.s32 120, %v1143_v2  ;;  %v193_v48 = vld [vmem:[#allocation5 + $0x68] sm:$0xff]  ;;  %v372_v49 = vld [vmem:[#allocation7 + $0x68] sm:$0xff] }
  0x44   :  { %941 = vmatpush3.bf16.msk.msra.mxu1 %vm940_vm12, %v1072_v11  ;;  %918 = vmatprep.subr.bf16.mxu0 %v1069_v1  ;;  %vm922_vm8 = vmpackc.low %vm86_vm5, %vm85_vm4  ;;  %vm140_vm12 = vcmp.eq.s32.totalorder %v66_v14, %v1157_v8  ;;  %vm143_vm4 = vcmp.eq.s32.totalorder %v69_v17, %v1157_v8  ;;  %v194_v50 = vld [vmem:[#allocation5 + $0x70] sm:$0xff]  ;;  %v373_v51 = vld [vmem:[#allocation7 + $0x70] sm:$0xff] }
  0x45   :  { %942 = vmatprep.subr.bf16.mxu1 %v1069_v1  ;;  %vm946_vm9 = vmpackc.low %vm139_vm7, %vm138_vm6  ;;  %vm91_vm7 = vcmp.eq.s32.totalorder %v70_v18, %v1152_v7  ;;  %v195_v52 = vld [vmem:[#allocation5 + $0x78] sm:$0xff]  ;;  %v374_v53 = vld [vmem:[#allocation7 + $0x78] sm:$0xff] }
  0x46   :  { %vm925_vm14 = vmpackc.low %vm88_vm11, %vm87_vm10  ;;  %vm145_vm10 = vcmp.eq.s32.totalorder %v71_v19, %v1157_v8  ;;  %v196_v54 = vld [vmem:[#allocation5 + $0x80] sm:$0xff]  ;;  %v375_v55 = vld [vmem:[#allocation7 + $0x80] sm:$0xff] }
  0x47   :  { %920 = vmatpush3.bf16.msk.msra.mxu0 %vm919_vm2, %v1072_v11  ;;  %vm949_vm15 = vmpackc.low %vm141_vm13, %vm140_vm12  ;;  %vm90_vm2 = vcmp.eq.s32.totalorder %v69_v17, %v1152_v7  ;;  %vm93_vm13 = vcmp.eq.s32.totalorder %v72_v20, %v1152_v7  ;;  %v197_v56 = vld [vmem:[#allocation5 + $0x88] sm:$0xff]  ;;  %v376_v57 = vld [vmem:[#allocation7 + $0x88] sm:$0xff] }
  0x48   :  { %944 = vmatpush3.bf16.msk.msra.mxu1 %vm943_vm3, %v1072_v11  ;;  %921 = vmatprep.subr.bf16.mxu0 %v1069_v1  ;;  %vm142_vm3 = vcmp.eq.s32.totalorder %v68_v16, %v1157_v8  ;;  %vm928_vm5 = vmpackc.low %vm90_vm2, %vm89_vm1  ;;  %vm147_vm1 = vcmp.eq.s32.totalorder %v73_v21, %v1157_v8  ;;  %v198_v58 = vld [vmem:[#allocation5 + $0x90] sm:$0xff]  ;;  %v377_v59 = vld [vmem:[#allocation7 + $0x90] sm:$0xff] }
  0x49   :  { %945 = vmatprep.subr.bf16.mxu1 %v1069_v1  ;;  %vm952_vm6 = vmpackc.low %vm143_vm4, %vm142_vm3 }
  0x4b   :  { %923 = vmatpush3.bf16.msk.msra.mxu0 %vm922_vm8, %v1072_v11  ;;  %vm92_vm8 = vcmp.eq.s32.totalorder %v71_v19, %v1152_v7 }
  0x4c   :  { %947 = vmatpush3.bf16.msk.msra.mxu1 %vm946_vm9, %v1072_v11  ;;  %924 = vmatprep.subr.bf16.mxu0 %v1069_v1  ;;  %vm144_vm9 = vcmp.eq.s32.totalorder %v70_v18, %v1157_v8  ;;  %vm931_vm11 = vmpackc.low %vm92_vm8, %vm91_vm7 }
  0x4d   :  { %948 = vmatprep.subr.bf16.mxu1 %v1069_v1  ;;  %vm955_vm12 = vmpackc.low %vm145_vm10, %vm144_vm9 }
  0x4f   :  { %926 = vmatpush3.bf16.msk.msra.mxu0 %vm925_vm14, %v1072_v11  ;;  %vm94_vm14 = vcmp.eq.s32.totalorder %v73_v21, %v1152_v7 }
  0x50   :  { %950 = vmatpush3.bf16.msk.msra.mxu1 %vm949_vm15, %v1072_v11  ;;  %927 = vmatprep.subr.bf16.mxu0 %v1069_v1  ;;  %vm146_vm15 = vcmp.eq.s32.totalorder %v72_v20, %v1157_v8  ;;  %vm934_vm2 = vmpackc.low %vm94_vm14, %vm93_vm13 }
  0x51   :  { %951 = vmatprep.subr.bf16.mxu1 %v1069_v1  ;;  %vm958_vm3 = vmpackc.low %vm147_vm1, %vm146_vm15 }
  0x53   :  { %929 = vmatpush3.bf16.msk.msra.mxu0 %vm928_vm5, %v1072_v11 }
  0x54   :  { %953 = vmatpush3.bf16.msk.msra.mxu1 %vm952_vm6, %v1072_v11  ;;  %930 = vmatprep.subr.bf16.mxu0 %v1069_v1 }
  0x55   :  { %954 = vmatprep.subr.bf16.mxu1 %v1069_v1 }
  0x57   :  { %932 = vmatpush3.bf16.msk.msra.mxu0 %vm931_vm11, %v1072_v11 }
  0x58   :  { %956 = vmatpush3.bf16.msk.msra.mxu1 %vm955_vm12, %v1072_v11  ;;  %933 = vmatprep.subr.bf16.mxu0 %v1069_v1 }
  0x59   :  { %957 = vmatprep.subr.bf16.mxu1 %v1069_v1 }
  0x5b   :  { %935 = vmatpush3.bf16.msk.msra.mxu0 %vm934_vm2, %v1072_v11 }
  0x5c   :  { %959 = vmatpush3.bf16.msk.msra.mxu1 %vm958_vm3, %v1072_v11 }
  0x5e   :  { %767 = vmatmul.mubr.f32.vlgmr.msra.gmra.mrb[0].mxu0 %v180_v22 }
  0x5f   :  { %856 = vmatmul.mubr.f32.vlgmr.msra.gmra.mrb[0].mxu1 %v359_v23  ;;  %769 = vmatprep.mubr.msk.f32.mxu0 %vm1070_vm0, %v1071_v3 }
  0x60   :  { %858 = vmatprep.mubr.msk.f32.mxu1 %vm1070_vm0, %v1071_v3 }
  0x62   :  { %770 = vmatmul.mubr.f32.gmra.mrb[2].mxu0 %v181_v24 }
  0x63   :  { %859 = vmatmul.mubr.f32.gmra.mrb[2].mxu1 %v360_v25  ;;  %772 = vmatprep.mubr.msk.f32.mxu0 %vm1070_vm0, %v1071_v3 }
  0x64   :  { %861 = vmatprep.mubr.msk.f32.mxu1 %vm1070_vm0, %v1071_v3 }
  0x66   :  { %773 = vmatmul.mubr.f32.gmra.mrb[4].mxu0 %v182_v26 }
  0x67   :  { %862 = vmatmul.mubr.f32.gmra.mrb[4].mxu1 %v361_v27  ;;  %775 = vmatprep.mubr.msk.f32.mxu0 %vm1070_vm0, %v1071_v3 }
  0x68   :  { %864 = vmatprep.mubr.msk.f32.mxu1 %vm1070_vm0, %v1071_v3 }
  0x6a   :  { %776 = vmatmul.mubr.f32.gmra.mrb[6].mxu0 %v183_v28 }
  0x6b   :  { %865 = vmatmul.mubr.f32.gmra.mrb[6].mxu1 %v362_v29  ;;  %778 = vmatprep.mubr.msk.f32.mxu0 %vm1070_vm0, %v1071_v3 }
  0x6c   :  { %867 = vmatprep.mubr.msk.f32.mxu1 %vm1070_vm0, %v1071_v3 }
  0x6e   :  { %779 = vmatmul.mubr.f32.gmra.mrb[8].mxu0 %v184_v30 }
  0x6f   :  { %868 = vmatmul.mubr.f32.gmra.mrb[8].mxu1 %v363_v31  ;;  %781 = vmatprep.mubr.msk.f32.mxu0 %vm1070_vm0, %v1071_v3 }
  0x70   :  { %870 = vmatprep.mubr.msk.f32.mxu1 %vm1070_vm0, %v1071_v3 }
  0x72   :  { %782 = vmatmul.mubr.f32.gmra.mrb[10].mxu0 %v185_v32 }
  0x73   :  { %871 = vmatmul.mubr.f32.gmra.mrb[10].mxu1 %v364_v33  ;;  %784 = vmatprep.mubr.msk.f32.mxu0 %vm1070_vm0, %v1071_v3 }
  0x74   :  { %873 = vmatprep.mubr.msk.f32.mxu1 %vm1070_vm0, %v1071_v3 }
  0x76   :  { %785 = vmatmul.mubr.f32.gmra.mrb[12].mxu0 %v186_v34 }
  0x77   :  { %874 = vmatmul.mubr.f32.gmra.mrb[12].mxu1 %v365_v35  ;;  %787 = vmatprep.mubr.msk.f32.mxu0 %vm1070_vm0, %v1071_v3 }
  0x78   :  { %876 = vmatprep.mubr.msk.f32.mxu1 %vm1070_vm0, %v1071_v3 }
  0x7a   :  { %788 = vmatmul.mubr.f32.gmra.mrb[14].mxu0 %v187_v36 }
  0x7b   :  { %877 = vmatmul.mubr.f32.gmra.mrb[14].mxu1 %v366_v37  ;;  %790 = vmatprep.mubr.msk.f32.mxu0 %vm1070_vm0, %v1071_v3 }
  0x7c   :  { %879 = vmatprep.mubr.msk.f32.mxu1 %vm1070_vm0, %v1071_v3 }
  0x7e   :  { %791 = vmatmul.mubr.f32.gmra.mrb[16].mxu0 %v188_v38 }
  0x7f   :  { %880 = vmatmul.mubr.f32.gmra.mrb[16].mxu1 %v367_v39  ;;  %793 = vmatprep.mubr.msk.f32.mxu0 %vm1070_vm0, %v1071_v3 }
  0x80   :  { %882 = vmatprep.mubr.msk.f32.mxu1 %vm1070_vm0, %v1071_v3 }
  0x82   :  { %794 = vmatmul.mubr.f32.gmra.mrb[18].mxu0 %v189_v40 }
  0x83   :  { %883 = vmatmul.mubr.f32.gmra.mrb[18].mxu1 %v368_v41  ;;  %796 = vmatprep.mubr.msk.f32.mxu0 %vm1070_vm0, %v1071_v3 }
  0x84   :  { %885 = vmatprep.mubr.msk.f32.mxu1 %vm1070_vm0, %v1071_v3 }
  0x86   :  { %797 = vmatmul.mubr.f32.gmra.mrb[20].mxu0 %v190_v42 }
  0x87   :  { %886 = vmatmul.mubr.f32.gmra.mrb[20].mxu1 %v369_v43  ;;  %799 = vmatprep.mubr.msk.f32.mxu0 %vm1070_vm0, %v1071_v3 }
  0x88   :  { %888 = vmatprep.mubr.msk.f32.mxu1 %vm1070_vm0, %v1071_v3 }
  0x8a   :  { %800 = vmatmul.mubr.f32.gmra.mrb[22].mxu0 %v191_v44 }
  0x8b   :  { %889 = vmatmul.mubr.f32.gmra.mrb[22].mxu1 %v370_v45  ;;  %802 = vmatprep.mubr.msk.f32.mxu0 %vm1070_vm0, %v1071_v3 }
  0x8c   :  { %891 = vmatprep.mubr.msk.f32.mxu1 %vm1070_vm0, %v1071_v3 }
  0x8e   :  { %803 = vmatmul.mubr.f32.gmra.mrb[24].mxu0 %v192_v46 }
  0x8f   :  { %892 = vmatmul.mubr.f32.gmra.mrb[24].mxu1 %v371_v47  ;;  %805 = vmatprep.mubr.msk.f32.mxu0 %vm1070_vm0, %v1071_v3 }
  0x90   :  { %894 = vmatprep.mubr.msk.f32.mxu1 %vm1070_vm0, %v1071_v3 }
  0x92   :  { %806 = vmatmul.mubr.f32.gmra.mrb[26].mxu0 %v193_v48 }
  0x93   :  { %895 = vmatmul.mubr.f32.gmra.mrb[26].mxu1 %v372_v49  ;;  %808 = vmatprep.mubr.msk.f32.mxu0 %vm1070_vm0, %v1071_v3 }
  0x94   :  { %897 = vmatprep.mubr.msk.f32.mxu1 %vm1070_vm0, %v1071_v3 }
  0x96   :  { %809 = vmatmul.mubr.f32.gmra.mrb[28].mxu0 %v194_v50 }
  0x97   :  { %898 = vmatmul.mubr.f32.gmra.mrb[28].mxu1 %v373_v51  ;;  %811 = vmatprep.mubr.msk.f32.mxu0 %vm1070_vm0, %v1071_v3 }
  0x98   :  { %900 = vmatprep.mubr.msk.f32.mxu1 %vm1070_vm0, %v1071_v3 }
  0x9a   :  { %812 = vmatmul.mubr.f32.gmra.mrb[30].mxu0 %v195_v52 }
  0x9b   :  { %901 = vmatmul.mubr.f32.gmra.mrb[30].mxu1 %v374_v53  ;;  %814 = vmatprep.mubr.msk.f32.mxu0 %vm1070_vm0, %v1071_v3 }
  0x9c   :  { %903 = vmatprep.mubr.msk.f32.mxu1 %vm1070_vm0, %v1071_v3 }
  0x9e   :  { %815 = vmatmul.mubr.f32.gmra.mrb[32].mxu0 %v196_v54 }
  0x9f   :  { %904 = vmatmul.mubr.f32.gmra.mrb[32].mxu1 %v375_v55  ;;  %817 = vmatprep.mubr.msk.f32.mxu0 %vm1070_vm0, %v1071_v3 }
  0xa0   :  { %906 = vmatprep.mubr.msk.f32.mxu1 %vm1070_vm0, %v1071_v3 }
  0xa2   :  { %818 = vmatmul.mubr.f32.gmra.mrb[34].mxu0 %v197_v56 }
  0xa3   :  { %907 = vmatmul.mubr.f32.gmra.mrb[34].mxu1 %v376_v57  ;;  %820 = vmatprep.mubr.msk.f32.mxu0 %vm1070_vm0, %v1071_v3 }
  0xa4   :  { %909 = vmatprep.mubr.msk.f32.mxu1 %vm1070_vm0, %v1071_v3 }
  0xa6   :  { %821 = vmatmul.mubr.f32.gmra.mrb[36].mxu0 %v198_v58 }
  0xa7   :  { %910 = vmatmul.mubr.f32.gmra.mrb[36].mxu1 %v377_v59 }
 0x131   :  { %v265_v60 = vpop.f32.mrb[0].mxu0 }
 0x132   :  { %v444_v61 = vpop.f32.mrb[0].mxu1  ;;  %v768_v62 = vpop.f32.mrb[1].mxu0 }
 0x133   :  { %v538_v63 = vmul.f32 %v444_v61, %v265_v60  ;;  %v857_v0 = vpop.f32.mrb[1].mxu1 }
 0x135   :  { %v270_v1 = vpop.f32.mrb[2].mxu0 }
 0x136   :  { %v449_v2 = vpop.f32.mrb[2].mxu1  ;;  %v771_v4 = vpop.f32.mrb[3].mxu0 }
 0x137   :  { %v539_v5 = vmul.f32 %v449_v2, %v270_v1  ;;  %v860_v6 = vpop.f32.mrb[3].mxu1 }
 0x139   :  { %v557_v7 = vadd.f32 %v539_v5, %v538_v63  ;;  %v275_v8 = vpop.f32.mrb[4].mxu0 }
 0x13a   :  { %v454_v9 = vpop.f32.mrb[4].mxu1  ;;  %v774_v10 = vpop.f32.mrb[5].mxu0 }
 0x13b   :  { %v540_v11 = vmul.f32 %v454_v9, %v275_v8  ;;  %v863_v12 = vpop.f32.mrb[5].mxu1 }
 0x13d   :  { %v558_v3 = vadd.f32 %v557_v7, %v540_v11  ;;  %v280_v13 = vpop.f32.mrb[6].mxu0 }
 0x13e   :  { %v459_v14 = vpop.f32.mrb[6].mxu1  ;;  %v777_v15 = vpop.f32.mrb[7].mxu0 }
 0x13f   :  { %v541_v16 = vmul.f32 %v459_v14, %v280_v13  ;;  %v866_v17 = vpop.f32.mrb[7].mxu1 }
 0x141   :  { %v559_v18 = vadd.f32 %v558_v3, %v541_v16  ;;  %v285_v19 = vpop.f32.mrb[8].mxu0 }
 0x142   :  { %v464_v20 = vpop.f32.mrb[8].mxu1  ;;  %v780_v21 = vpop.f32.mrb[9].mxu0 }
 0x143   :  { %v542_v22 = vmul.f32 %v464_v20, %v285_v19  ;;  %v869_v23 = vpop.f32.mrb[9].mxu1 }
 0x145   :  { %v560_v24 = vadd.f32 %v559_v18, %v542_v22  ;;  %v290_v25 = vpop.f32.mrb[10].mxu0 }
 0x146   :  { %v469_v26 = vpop.f32.mrb[10].mxu1  ;;  %v783_v27 = vpop.f32.mrb[11].mxu0 }
 0x147   :  { %v543_v28 = vmul.f32 %v469_v26, %v290_v25  ;;  %v872_v29 = vpop.f32.mrb[11].mxu1 }
 0x149   :  { %v561_v30 = vadd.f32 %v560_v24, %v543_v28  ;;  %v295_v31 = vpop.f32.mrb[12].mxu0 }
 0x14a   :  { %v474_v32 = vpop.f32.mrb[12].mxu1  ;;  %v786_v33 = vpop.f32.mrb[13].mxu0 }
 0x14b   :  { %v544_v34 = vmul.f32 %v474_v32, %v295_v31  ;;  %v875_v35 = vpop.f32.mrb[13].mxu1 }
 0x14d   :  { %v562_v36 = vadd.f32 %v561_v30, %v544_v34  ;;  %v300_v37 = vpop.f32.mrb[14].mxu0 }
 0x14e   :  { %v479_v38 = vpop.f32.mrb[14].mxu1  ;;  %v789_v39 = vpop.f32.mrb[15].mxu0 }
 0x14f   :  { %v545_v40 = vmul.f32 %v479_v38, %v300_v37  ;;  %v878_v41 = vpop.f32.mrb[15].mxu1 }
 0x151   :  { %v563_v42 = vadd.f32 %v562_v36, %v545_v40  ;;  %v305_v43 = vpop.f32.mrb[16].mxu0 }
 0x152   :  { %v484_v44 = vpop.f32.mrb[16].mxu1  ;;  %v792_v45 = vpop.f32.mrb[17].mxu0 }
 0x153   :  { %v546_v46 = vmul.f32 %v484_v44, %v305_v43  ;;  %v881_v47 = vpop.f32.mrb[17].mxu1 }
 0x155   :  { %v564_v48 = vadd.f32 %v563_v42, %v546_v46  ;;  %v310_v49 = vpop.f32.mrb[18].mxu0 }
 0x156   :  { %v489_v50 = vpop.f32.mrb[18].mxu1  ;;  %v795_v51 = vpop.f32.mrb[19].mxu0 }
 0x157   :  { %v547_v52 = vmul.f32 %v489_v50, %v310_v49  ;;  %v884_v53 = vpop.f32.mrb[19].mxu1 }
 0x159   :  { %v565_v54 = vadd.f32 %v564_v48, %v547_v52  ;;  %v315_v55 = vpop.f32.mrb[20].mxu0 }
 0x15a   :  { %v494_v56 = vpop.f32.mrb[20].mxu1  ;;  %v798_v57 = vpop.f32.mrb[21].mxu0 }
 0x15b   :  { %v548_v58 = vmul.f32 %v494_v56, %v315_v55  ;;  %v887_v59 = vpop.f32.mrb[21].mxu1 }
 0x15d   :  { %v566_v60 = vadd.f32 %v565_v54, %v548_v58  ;;  %v320_v61 = vpop.f32.mrb[22].mxu0 }
 0x15e   :  { %v499_v62 = vpop.f32.mrb[22].mxu1  ;;  %v801_v63 = vpop.f32.mrb[23].mxu0 }
 0x15f   :  { %v549_v0 = vmul.f32 %v499_v62, %v320_v61  ;;  %v890_v1 = vpop.f32.mrb[23].mxu1 }
 0x161   :  { %v567_v2 = vadd.f32 %v566_v60, %v549_v0  ;;  %v325_v4 = vpop.f32.mrb[24].mxu0 }
 0x162   :  { %v504_v5 = vpop.f32.mrb[24].mxu1  ;;  %v804_v6 = vpop.f32.mrb[25].mxu0 }
 0x163   :  { %v550_v7 = vmul.f32 %v504_v5, %v325_v4  ;;  %v893_v8 = vpop.f32.mrb[25].mxu1 }
 0x165   :  { %v568_v9 = vadd.f32 %v567_v2, %v550_v7  ;;  %v330_v10 = vpop.f32.mrb[26].mxu0 }
 0x166   :  { %v509_v11 = vpop.f32.mrb[26].mxu1  ;;  %v807_v12 = vpop.f32.mrb[27].mxu0 }
 0x167   :  { %v551_v3 = vmul.f32 %v509_v11, %v330_v10  ;;  %v896_v13 = vpop.f32.mrb[27].mxu1 }
 0x169   :  { %v569_v14 = vadd.f32 %v568_v9, %v551_v3  ;;  %v335_v15 = vpop.f32.mrb[28].mxu0 }
 0x16a   :  { %v514_v16 = vpop.f32.mrb[28].mxu1  ;;  %v810_v17 = vpop.f32.mrb[29].mxu0 }
 0x16b   :  { %v552_v18 = vmul.f32 %v514_v16, %v335_v15  ;;  %v899_v19 = vpop.f32.mrb[29].mxu1 }
 0x16d   :  { %v570_v20 = vadd.f32 %v569_v14, %v552_v18  ;;  %v340_v21 = vpop.f32.mrb[30].mxu0 }
 0x16e   :  { %v519_v22 = vpop.f32.mrb[30].mxu1  ;;  %v813_v23 = vpop.f32.mrb[31].mxu0 }
 0x16f   :  { %v553_v24 = vmul.f32 %v519_v22, %v340_v21  ;;  %v902_v25 = vpop.f32.mrb[31].mxu1 }
 0x171   :  { %v571_v26 = vadd.f32 %v570_v20, %v553_v24  ;;  %v345_v27 = vpop.f32.mrb[32].mxu0 }
 0x172   :  { %v524_v28 = vpop.f32.mrb[32].mxu1  ;;  %v816_v29 = vpop.f32.mrb[33].mxu0 }
 0x173   :  { %v554_v30 = vmul.f32 %v524_v28, %v345_v27  ;;  %v905_v31 = vpop.f32.mrb[33].mxu1 }
 0x175   :  { %v572_v32 = vadd.f32 %v571_v26, %v554_v30  ;;  %v350_v33 = vpop.f32.mrb[34].mxu0 }
 0x176   :  { %v529_v34 = vpop.f32.mrb[34].mxu1  ;;  %v819_v35 = vpop.f32.mrb[35].mxu0 }
 0x177   :  { %v555_v36 = vmul.f32 %v529_v34, %v350_v33  ;;  %v908_v37 = vpop.f32.mrb[35].mxu1 }
 0x179   :  { %v573_v38 = vadd.f32 %v572_v32, %v555_v36  ;;  %v355_v39 = vpop.f32.mrb[36].mxu0 }
 0x17a   :  { %v534_v40 = vpop.f32.mrb[36].mxu1  ;;  %v822_v41 = vpop.f32.mrb[37].mxu0 }
 0x17b   :  { %v556_v42 = vmul.f32 %v534_v40, %v355_v39  ;;  %v911_v43 = vpop.f32.mrb[37].mxu1 }
 0x17d   :  { %v574_v44 = vadd.f32 %v573_v38, %v556_v42 }
 0x17f   :  { %v575_v45 = vrot.slane %v574_v44, 4 }
 0x181   :  { %v576_v46 = vadd.f32 %v575_v45, %v574_v44 }
 0x183   :  { %v577_v47 = vrot.slane %v576_v46, 2 }
 0x185   :  { %v578_v48 = vadd.f32 %v577_v47, %v576_v46 }
 0x187   :  { %v579_v49 = vrot.slane %v578_v48, 1 }
 0x189   :  { %v580_v50 = vadd.f32 %v579_v49, %v578_v48 }
 0x18b   :  { %581 = vst [vmem:[#allocation8] sm:$0x1] %v580_v50 }
 0x18c   :  { %1047 = shalt.err (!%p1044_p0)
}
 0x18d   :  { %s1048_s6 = scalar_lea.hbm %s1323_s4, 16 }
 0x18e   :  { %p1049_p1 = scmp.ne.s32.totalorder %s1323_s4, %s1048_s6  ;;  %p1052_p2 = scmp.lt.u32.totalorder %s1048_s6, %s1323_s4 }
 0x190   :  { %p1054_p3 = pnand %p1052_p2, %p1049_p1 }
 0x192   :  { %1057 = shalt.err (!%p1054_p3)
}
 0x193   :  { %591 = dma.vmem_to_hbm [thread:$0]  %s589_s26, 16, %s1323_s4, [#allocation4]  }
 0x194   :  { %1062 = dma.done.wait [#allocation4], 16  }
 0x195   :  { %1063 = vsyncadd [#allocation4], 4294967280 }
 0x196   :  { %595 = vsyncpa [#allocation3], 1 }
 0x197   :  { %596 = vsyncpa [#allocation6], 1 }
 0x198   :  { %597 = vsyncpa [#allocation4], 1 }

// kernel: tpu_custom_call.1
= control target key start
LH: loop header
LB: loop body
LE: loop exit
PB: predicated region body
PF: predicated region fallthrough
CT: control target
= control target key end

     0   :  { %9 = vsyncpa [#allocation3], 0  ;;  %s1319_s0 = inlined_call_operand.hbm [shape: s32[1,128], index: 0, kind: input, shape index: {}]   ;;  %s1320_s1 = inlined_call_operand.vmem [shape: s32[1,128], index: 1, kind: input, shape index: {}]   ;;  %s1321_s2 = inlined_call_operand.hbm [shape: f32[152,128], index: 2, kind: input, shape index: {}]   ;;  %s1322_s3 = inlined_call_operand.hbm [shape: f32[152,128], index: 3, kind: input, shape index: {}]   ;;  %s1323_s4 = inlined_call_operand.hbm [shape: f32[1,128], index: 4, kind: output, shape index: {}]  }
   0x1   :  { %10 = vsyncpa [#allocation6], 0 }
   0x2   :  { %11 = vsyncpa [#allocation4], 0  ;;  %s1064_s15 = smov [#allocation5]   ;;  %s970_s19 = scalar_lea.hbm %s1321_s2, 2432 }
   0x3   :  { %s29_s16 = sshll.u32 %s1064_s15, 4  ;;  %p971_p0 = scmp.ne.s32.totalorder %s1321_s2, %s970_s19  ;;  %s30_s16 = int_to_ptr.vmem [resolvable:$true] %s29_s16 }
   0x4   :  { %p974_p1 = scmp.lt.u32.totalorder %s970_s19, %s1321_s2 }
   0x6   :  { %p976_p2 = pnand %p974_p1, %p971_p0 }
   0x8   :  { %979 = shalt.err (!%p976_p2)
}
   0x9   :  { %s980_s24 = scalar_lea.vmem %s30_s16, 2432  ;;  %p985_p4 = scmp.lt.s32.totalorder %s30_s16, %s30_s16 }
   0xa   :  { %p981_p3 = scmp.ne.s32.totalorder %s30_s16, %s980_s24  ;;  %p986_p5 = scmp.lt.s32.totalorder %s980_s24, %s980_s24 }
   0xc   :  { %p987_p6 = por %p986_p5, %p985_p4 }
   0xe   :  { %p988_p7 = pnand %p987_p6, %p981_p3 }
  0x10   :  { %991 = shalt.err (!%p988_p7)
}
  0x11   :  { %s1065_s25 = smov 128   ;;  %s1066_s26 = smov 8  }
  0x12   :  { %35 = dma.hbm_to_vmem [thread:$0]  %s1321_s2, 2432, %s30_s16, [#allocation6], %s1065_s25, %s1065_s25, %s1066_s26  }
  0x13   :  { %s1067_s29 = smov [#allocation2]   ;;  %s1068_s5 = smov [#allocation7]  }
  0x14   :  { %s18_s30 = sshll.u32 %s1067_s29, 4  ;;  %s41_s6 = sshll.u32 %s1068_s5, 4  ;;  %s19_s30 = int_to_ptr.vmem [resolvable:$true] %s18_s30  ;;  %s42_s6 = int_to_ptr.vmem [resolvable:$true] %s41_s6 }
  0x15   :  { %s992_s9 = scalar_lea.hbm %s1319_s0, 16 }
  0x16   :  { %p993_p8 = scmp.ne.s32.totalorder %s1319_s0, %s992_s9  ;;  %p996_p9 = scmp.lt.u32.totalorder %s992_s9, %s1319_s0 }
  0x18   :  { %p998_p10 = pnand %p996_p9, %p993_p8 }
  0x1a   :  { %1001 = shalt.err (!%p998_p10)
}
  0x1b   :  { %s1002_s2 = scalar_lea.vmem %s19_s30, 16  ;;  %s1006_s14 = scalar_lea.vmem %s19_s30, 32 }
  0x1c   :  { %p1003_p11 = scmp.ne.s32.totalorder %s19_s30, %s1002_s2  ;;  %p1007_p12 = scmp.lt.s32.totalorder %s19_s30, %s19_s30 }
  0x1d   :  { %p1008_p13 = scmp.lt.s32.totalorder %s1006_s14, %s1002_s2 }
  0x1f   :  { %p1009_p0 = por %p1008_p13, %p1007_p12 }
  0x21   :  { %p1010_p1 = pnand %p1009_p0, %p1003_p11 }
  0x23   :  { %1013 = shalt.err (!%p1010_p1)
}
  0x24   :  { %21 = dma.hbm_to_vmem [thread:$0]  %s1319_s0, 16, %s19_s30, [#allocation3]  }
  0x25   :  { %s1014_s19 = scalar_lea.hbm %s1322_s3, 2432 }
  0x26   :  { %p1015_p2 = scmp.ne.s32.totalorder %s1322_s3, %s1014_s19  ;;  %p1018_p3 = scmp.lt.u32.totalorder %s1014_s19, %s1322_s3 }
  0x28   :  { %p1020_p4 = pnand %p1018_p3, %p1015_p2 }
  0x2a   :  { %1023 = shalt.err (!%p1020_p4)
}
  0x2b   :  { %s1024_s24 = scalar_lea.vmem %s42_s6, 2432  ;;  %p1029_p6 = scmp.lt.s32.totalorder %s42_s6, %s42_s6 }
  0x2c   :  { %p1025_p5 = scmp.ne.s32.totalorder %s42_s6, %s1024_s24  ;;  %p1030_p7 = scmp.lt.s32.totalorder %s1024_s24, %s1024_s24 }
  0x2e   :  { %p1031_p8 = por %p1030_p7, %p1029_p6 }
  0x30   :  { %p1032_p9 = pnand %p1031_p8, %p1025_p5 }
  0x32   :  { %1035 = shalt.err (!%p1032_p9)
}
  0x33   :  { %47 = dma.hbm_to_vmem [thread:$0]  %s1322_s3, 2432, %s42_s6, [#allocation6], %s1065_s25, %s1065_s25, %s1066_s26  }
  0x34   :  { %1058 = dma.done.wait [#allocation3], 16  }
  0x35   :  { %1059 = vsyncadd [#allocation3], 4294967280 }
  0x36   :  { %1060 = dma.done.wait [#allocation6], 4864  }
  0x37   :  { %1061 = vsyncadd [#allocation6], 4294962432  ;;  %v57_v0 = vlaneseq  ;;  %v1069_v1 = vmov 0.0|0.0   ;;  %vm1070_vm0 = vmmov 0   ;;  %v1071_v3 = vmov 0.0   ;;  %v180_v22 = vld [vmem:[#allocation5] sm:$0xff] }
  0x38   :  { %912 = vmatprep.subr.bf16.mxu0 %v1069_v1  ;;  %936 = vmatprep.subr.bf16.mxu1 %v1069_v1  ;;  %v1152_v7 = vld [vmem:[#allocation2] ss:$0 sm:$0xff]  ;;  %v1072_v11 = vmov 1.0|1.0   ;;  %v181_v24 = vld [vmem:[#allocation5 + $0x8] sm:$0xff]  ;;  %v360_v25 = vld [vmem:[#allocation7 + $0x8] sm:$0xff] }
  0x39   :  { %v1143_v2 = vshrl.u32 %v57_v0, 7  ;;  %766 = vmatprep.mubr.msk.f32.mxu0 %vm1070_vm0, %v1071_v3  ;;  %855 = vmatprep.mubr.msk.f32.mxu1 %vm1070_vm0, %v1071_v3  ;;  %v1157_v8 = vld [vmem:[%s1320_s1] ss:$0 sm:$0xff]  ;;  %v182_v26 = vld [vmem:[#allocation5 + $0x10] sm:$0xff]  ;;  %v361_v27 = vld [vmem:[#allocation7 + $0x10] sm:$0xff]  ;;  %s1073_s1 = smov [#allocation8]  }
  0x3a   :  { %v359_v23 = vld [vmem:[#allocation7] sm:$0xff]  ;;  %v362_v29 = vld [vmem:[#allocation7 + $0x18] sm:$0xff]  ;;  %v184_v30 = vld [vmem:[#allocation5 + $0x20] sm:$0xff]  ;;  %s588_s26 = sshll.u32 %s1073_s1, 4  ;;  %s589_s26 = int_to_ptr.vmem [resolvable:$true] %s588_s26 }
  0x3b   :  { %v59_v4 = vadd.s32 8, %v1143_v2  ;;  %v60_v5 = vadd.s32 16, %v1143_v2  ;;  %v61_v6 = vadd.s32 24, %v1143_v2  ;;  %v62_v9 = vadd.s32 32, %v1143_v2  ;;  %v183_v28 = vld [vmem:[#allocation5 + $0x18] sm:$0xff]  ;;  %v185_v32 = vld [vmem:[#allocation5 + $0x28] sm:$0xff]  ;;  %p1041_p11 = scmp.lt.s32.totalorder %s589_s26, %s589_s26 }
  0x3c   :  { %v63_v10 = vadd.s32 40, %v1143_v2  ;;  %vm79_vm1 = vcmp.eq.s32.totalorder %v1143_v2, %v1152_v7  ;;  %vm132_vm3 = vcmp.eq.s32.totalorder %v1143_v2, %v1157_v8  ;;  %v64_v12 = vadd.s32 48, %v1143_v2  ;;  %v363_v31 = vld [vmem:[#allocation7 + $0x20] sm:$0xff]  ;;  %v364_v33 = vld [vmem:[#allocation7 + $0x28] sm:$0xff]  ;;  %v186_v34 = vld [vmem:[#allocation5 + $0x30] sm:$0xff]  ;;  %s1036_s28 = scalar_lea.vmem %s589_s26, 16 }
  0x3d   :  { %vm80_vm2 = vcmp.eq.s32.totalorder %v59_v4, %v1152_v7  ;;  %vm133_vm4 = vcmp.eq.s32.totalorder %v59_v4, %v1157_v8  ;;  %vm81_vm6 = vcmp.eq.s32.totalorder %v60_v5, %v1152_v7  ;;  %vm82_vm7 = vcmp.eq.s32.totalorder %v61_v6, %v1152_v7  ;;  %v365_v35 = vld [vmem:[#allocation7 + $0x30] sm:$0xff]  ;;  %v187_v36 = vld [vmem:[#allocation5 + $0x38] sm:$0xff]  ;;  %v366_v37 = vld [vmem:[#allocation7 + $0x38] sm:$0xff]  ;;  %p1037_p10 = scmp.ne.s32.totalorder %s589_s26, %s1036_s28  ;;  %s1040_s29 = scalar_lea.vmem %s589_s26, 32 }
  0x3e   :  { %vm913_vm5 = vmpackc.low %vm80_vm2, %vm79_vm1  ;;  %vm134_vm8 = vcmp.eq.s32.totalorder %v60_v5, %v1157_v8  ;;  %vm135_vm9 = vcmp.eq.s32.totalorder %v61_v6, %v1157_v8  ;;  %vm83_vm13 = vcmp.eq.s32.totalorder %v62_v9, %v1152_v7  ;;  %vm84_vm14 = vcmp.eq.s32.totalorder %v63_v10, %v1152_v7  ;;  %v188_v38 = vld [vmem:[#allocation5 + $0x40] sm:$0xff]  ;;  %v367_v39 = vld [vmem:[#allocation7 + $0x40] sm:$0xff]  ;;  %p1042_p12 = scmp.lt.s32.totalorder %s1040_s29, %s1036_s28 }
  0x3f   :  { %914 = vmatpush3.bf16.msk.msra.mxu0 %vm913_vm5, %v1072_v11  ;;  %vm937_vm10 = vmpackc.low %vm133_vm4, %vm132_vm3  ;;  %v65_v13 = vadd.s32 56, %v1143_v2  ;;  %vm136_vm15 = vcmp.eq.s32.totalorder %v62_v9, %v1157_v8  ;;  %vm137_vm1 = vcmp.eq.s32.totalorder %v63_v10, %v1157_v8  ;;  %vm85_vm4 = vcmp.eq.s32.totalorder %v64_v12, %v1152_v7  ;;  %v189_v40 = vld [vmem:[#allocation5 + $0x48] sm:$0xff]  ;;  %v368_v41 = vld [vmem:[#allocation7 + $0x48] sm:$0xff] }
  0x40   :  { %938 = vmatpush3.bf16.msk.msra.mxu1 %vm937_vm10, %v1072_v11  ;;  %915 = vmatprep.subr.bf16.mxu0 %v1069_v1  ;;  %vm916_vm11 = vmpackc.low %vm82_vm7, %vm81_vm6  ;;  %v66_v14 = vadd.s32 64, %v1143_v2  ;;  %v67_v15 = vadd.s32 72, %v1143_v2  ;;  %vm138_vm6 = vcmp.eq.s32.totalorder %v64_v12, %v1157_v8  ;;  %v68_v16 = vadd.s32 80, %v1143_v2  ;;  %v190_v42 = vld [vmem:[#allocation5 + $0x50] sm:$0xff]  ;;  %v369_v43 = vld [vmem:[#allocation7 + $0x50] sm:$0xff]  ;;  %p1043_p13 = por %p1042_p12, %p1041_p11 }
  0x41   :  { %939 = vmatprep.subr.bf16.mxu1 %v1069_v1  ;;  %vm940_vm12 = vmpackc.low %vm135_vm9, %vm134_vm8  ;;  %vm86_vm5 = vcmp.eq.s32.totalorder %v65_v13, %v1152_v7  ;;  %vm139_vm7 = vcmp.eq.s32.totalorder %v65_v13, %v1157_v8  ;;  %v69_v17 = vadd.s32 88, %v1143_v2  ;;  %v70_v18 = vadd.s32 96, %v1143_v2  ;;  %v191_v44 = vld [vmem:[#allocation5 + $0x58] sm:$0xff]  ;;  %v370_v45 = vld [vmem:[#allocation7 + $0x58] sm:$0xff] }
  0x42   :  { %vm919_vm2 = vmpackc.low %vm84_vm14, %vm83_vm13  ;;  %vm87_vm10 = vcmp.eq.s32.totalorder %v66_v14, %v1152_v7  ;;  %vm141_vm13 = vcmp.eq.s32.totalorder %v67_v15, %v1157_v8  ;;  %v71_v19 = vadd.s32 104, %v1143_v2  ;;  %v72_v20 = vadd.s32 112, %v1143_v2  ;;  %v192_v46 = vld [vmem:[#allocation5 + $0x60] sm:$0xff]  ;;  %v371_v47 = vld [vmem:[#allocation7 + $0x60] sm:$0xff]  ;;  %p1044_p0 = pnand %p1043_p13, %p1037_p10 }
  0x43   :  { %917 = vmatpush3.bf16.msk.msra.mxu0 %vm916_vm11, %v1072_v11  ;;  %vm943_vm3 = vmpackc.low %vm137_vm1, %vm136_vm15  ;;  %vm88_vm11 = vcmp.eq.s32.totalorder %v67_v15, %v1152_v7  ;;  %vm89_vm1 = vcmp.eq.s32.totalorder %v68_v16, %v1152_v7  ;;  %v73_v21 = vadd.s32 120, %v1143_v2  ;;  %v193_v48 = vld [vmem:[#allocation5 + $0x68] sm:$0xff]  ;;  %v372_v49 = vld [vmem:[#allocation7 + $0x68] sm:$0xff] }
  0x44   :  { %941 = vmatpush3.bf16.msk.msra.mxu1 %vm940_vm12, %v1072_v11  ;;  %918 = vmatprep.subr.bf16.mxu0 %v1069_v1  ;;  %vm922_vm8 = vmpackc.low %vm86_vm5, %vm85_vm4  ;;  %vm140_vm12 = vcmp.eq.s32.totalorder %v66_v14, %v1157_v8  ;;  %vm143_vm4 = vcmp.eq.s32.totalorder %v69_v17, %v1157_v8  ;;  %v194_v50 = vld [vmem:[#allocation5 + $0x70] sm:$0xff]  ;;  %v373_v51 = vld [vmem:[#allocation7 + $0x70] sm:$0xff] }
  0x45   :  { %942 = vmatprep.subr.bf16.mxu1 %v1069_v1  ;;  %vm946_vm9 = vmpackc.low %vm139_vm7, %vm138_vm6  ;;  %vm91_vm7 = vcmp.eq.s32.totalorder %v70_v18, %v1152_v7  ;;  %v195_v52 = vld [vmem:[#allocation5 + $0x78] sm:$0xff]  ;;  %v374_v53 = vld [vmem:[#allocation7 + $0x78] sm:$0xff] }
  0x46   :  { %vm925_vm14 = vmpackc.low %vm88_vm11, %vm87_vm10  ;;  %vm145_vm10 = vcmp.eq.s32.totalorder %v71_v19, %v1157_v8  ;;  %v196_v54 = vld [vmem:[#allocation5 + $0x80] sm:$0xff]  ;;  %v375_v55 = vld [vmem:[#allocation7 + $0x80] sm:$0xff] }
  0x47   :  { %920 = vmatpush3.bf16.msk.msra.mxu0 %vm919_vm2, %v1072_v11  ;;  %vm949_vm15 = vmpackc.low %vm141_vm13, %vm140_vm12  ;;  %vm90_vm2 = vcmp.eq.s32.totalorder %v69_v17, %v1152_v7  ;;  %vm93_vm13 = vcmp.eq.s32.totalorder %v72_v20, %v1152_v7  ;;  %v197_v56 = vld [vmem:[#allocation5 + $0x88] sm:$0xff]  ;;  %v376_v57 = vld [vmem:[#allocation7 + $0x88] sm:$0xff] }
  0x48   :  { %944 = vmatpush3.bf16.msk.msra.mxu1 %vm943_vm3, %v1072_v11  ;;  %921 = vmatprep.subr.bf16.mxu0 %v1069_v1  ;;  %vm142_vm3 = vcmp.eq.s32.totalorder %v68_v16, %v1157_v8  ;;  %vm928_vm5 = vmpackc.low %vm90_vm2, %vm89_vm1  ;;  %vm147_vm1 = vcmp.eq.s32.totalorder %v73_v21, %v1157_v8  ;;  %v198_v58 = vld [vmem:[#allocation5 + $0x90] sm:$0xff]  ;;  %v377_v59 = vld [vmem:[#allocation7 + $0x90] sm:$0xff] }
  0x49   :  { %945 = vmatprep.subr.bf16.mxu1 %v1069_v1  ;;  %vm952_vm6 = vmpackc.low %vm143_vm4, %vm142_vm3 }
  0x4b   :  { %923 = vmatpush3.bf16.msk.msra.mxu0 %vm922_vm8, %v1072_v11  ;;  %vm92_vm8 = vcmp.eq.s32.totalorder %v71_v19, %v1152_v7 }
  0x4c   :  { %947 = vmatpush3.bf16.msk.msra.mxu1 %vm946_vm9, %v1072_v11  ;;  %924 = vmatprep.subr.bf16.mxu0 %v1069_v1  ;;  %vm144_vm9 = vcmp.eq.s32.totalorder %v70_v18, %v1157_v8  ;;  %vm931_vm11 = vmpackc.low %vm92_vm8, %vm91_vm7 }
  0x4d   :  { %948 = vmatprep.subr.bf16.mxu1 %v1069_v1  ;;  %vm955_vm12 = vmpackc.low %vm145_vm10, %vm144_vm9 }
  0x4f   :  { %926 = vmatpush3.bf16.msk.msra.mxu0 %vm925_vm14, %v1072_v11  ;;  %vm94_vm14 = vcmp.eq.s32.totalorder %v73_v21, %v1152_v7 }
  0x50   :  { %950 = vmatpush3.bf16.msk.msra.mxu1 %vm949_vm15, %v1072_v11  ;;  %927 = vmatprep.subr.bf16.mxu0 %v1069_v1  ;;  %vm146_vm15 = vcmp.eq.s32.totalorder %v72_v20, %v1157_v8  ;;  %vm934_vm2 = vmpackc.low %vm94_vm14, %vm93_vm13 }
  0x51   :  { %951 = vmatprep.subr.bf16.mxu1 %v1069_v1  ;;  %vm958_vm3 = vmpackc.low %vm147_vm1, %vm146_vm15 }
  0x53   :  { %929 = vmatpush3.bf16.msk.msra.mxu0 %vm928_vm5, %v1072_v11 }
  0x54   :  { %953 = vmatpush3.bf16.msk.msra.mxu1 %vm952_vm6, %v1072_v11  ;;  %930 = vmatprep.subr.bf16.mxu0 %v1069_v1 }
  0x55   :  { %954 = vmatprep.subr.bf16.mxu1 %v1069_v1 }
  0x57   :  { %932 = vmatpush3.bf16.msk.msra.mxu0 %vm931_vm11, %v1072_v11 }
  0x58   :  { %956 = vmatpush3.bf16.msk.msra.mxu1 %vm955_vm12, %v1072_v11  ;;  %933 = vmatprep.subr.bf16.mxu0 %v1069_v1 }
  0x59   :  { %957 = vmatprep.subr.bf16.mxu1 %v1069_v1 }
  0x5b   :  { %935 = vmatpush3.bf16.msk.msra.mxu0 %vm934_vm2, %v1072_v11 }
  0x5c   :  { %959 = vmatpush3.bf16.msk.msra.mxu1 %vm958_vm3, %v1072_v11 }
  0x5e   :  { %767 = vmatmul.mubr.f32.vlgmr.msra.gmra.mrb[0].mxu0 %v180_v22 }
  0x5f   :  { %856 = vmatmul.mubr.f32.vlgmr.msra.gmra.mrb[0].mxu1 %v359_v23  ;;  %769 = vmatprep.mubr.msk.f32.mxu0 %vm1070_vm0, %v1071_v3 }
  0x60   :  { %858 = vmatprep.mubr.msk.f32.mxu1 %vm1070_vm0, %v1071_v3 }
  0x62   :  { %770 = vmatmul.mubr.f32.gmra.mrb[2].mxu0 %v181_v24 }
  0x63   :  { %859 = vmatmul.mubr.f32.gmra.mrb[2].mxu1 %v360_v25  ;;  %772 = vmatprep.mubr.msk.f32.mxu0 %vm1070_vm0, %v1071_v3 }
  0x64   :  { %861 = vmatprep.mubr.msk.f32.mxu1 %vm1070_vm0, %v1071_v3 }
  0x66   :  { %773 = vmatmul.mubr.f32.gmra.mrb[4].mxu0 %v182_v26 }
  0x67   :  { %862 = vmatmul.mubr.f32.gmra.mrb[4].mxu1 %v361_v27  ;;  %775 = vmatprep.mubr.msk.f32.mxu0 %vm1070_vm0, %v1071_v3 }
  0x68   :  { %864 = vmatprep.mubr.msk.f32.mxu1 %vm1070_vm0, %v1071_v3 }
  0x6a   :  { %776 = vmatmul.mubr.f32.gmra.mrb[6].mxu0 %v183_v28 }
  0x6b   :  { %865 = vmatmul.mubr.f32.gmra.mrb[6].mxu1 %v362_v29  ;;  %778 = vmatprep.mubr.msk.f32.mxu0 %vm1070_vm0, %v1071_v3 }
  0x6c   :  { %867 = vmatprep.mubr.msk.f32.mxu1 %vm1070_vm0, %v1071_v3 }
  0x6e   :  { %779 = vmatmul.mubr.f32.gmra.mrb[8].mxu0 %v184_v30 }
  0x6f   :  { %868 = vmatmul.mubr.f32.gmra.mrb[8].mxu1 %v363_v31  ;;  %781 = vmatprep.mubr.msk.f32.mxu0 %vm1070_vm0, %v1071_v3 }
  0x70   :  { %870 = vmatprep.mubr.msk.f32.mxu1 %vm1070_vm0, %v1071_v3 }
  0x72   :  { %782 = vmatmul.mubr.f32.gmra.mrb[10].mxu0 %v185_v32 }
  0x73   :  { %871 = vmatmul.mubr.f32.gmra.mrb[10].mxu1 %v364_v33  ;;  %784 = vmatprep.mubr.msk.f32.mxu0 %vm1070_vm0, %v1071_v3 }
  0x74   :  { %873 = vmatprep.mubr.msk.f32.mxu1 %vm1070_vm0, %v1071_v3 }
  0x76   :  { %785 = vmatmul.mubr.f32.gmra.mrb[12].mxu0 %v186_v34 }
  0x77   :  { %874 = vmatmul.mubr.f32.gmra.mrb[12].mxu1 %v365_v35  ;;  %787 = vmatprep.mubr.msk.f32.mxu0 %vm1070_vm0, %v1071_v3 }
  0x78   :  { %876 = vmatprep.mubr.msk.f32.mxu1 %vm1070_vm0, %v1071_v3 }
  0x7a   :  { %788 = vmatmul.mubr.f32.gmra.mrb[14].mxu0 %v187_v36 }
  0x7b   :  { %877 = vmatmul.mubr.f32.gmra.mrb[14].mxu1 %v366_v37  ;;  %790 = vmatprep.mubr.msk.f32.mxu0 %vm1070_vm0, %v1071_v3 }
  0x7c   :  { %879 = vmatprep.mubr.msk.f32.mxu1 %vm1070_vm0, %v1071_v3 }
  0x7e   :  { %791 = vmatmul.mubr.f32.gmra.mrb[16].mxu0 %v188_v38 }
  0x7f   :  { %880 = vmatmul.mubr.f32.gmra.mrb[16].mxu1 %v367_v39  ;;  %793 = vmatprep.mubr.msk.f32.mxu0 %vm1070_vm0, %v1071_v3 }
  0x80   :  { %882 = vmatprep.mubr.msk.f32.mxu1 %vm1070_vm0, %v1071_v3 }
  0x82   :  { %794 = vmatmul.mubr.f32.gmra.mrb[18].mxu0 %v189_v40 }
  0x83   :  { %883 = vmatmul.mubr.f32.gmra.mrb[18].mxu1 %v368_v41  ;;  %796 = vmatprep.mubr.msk.f32.mxu0 %vm1070_vm0, %v1071_v3 }
  0x84   :  { %885 = vmatprep.mubr.msk.f32.mxu1 %vm1070_vm0, %v1071_v3 }
  0x86   :  { %797 = vmatmul.mubr.f32.gmra.mrb[20].mxu0 %v190_v42 }
  0x87   :  { %886 = vmatmul.mubr.f32.gmra.mrb[20].mxu1 %v369_v43  ;;  %799 = vmatprep.mubr.msk.f32.mxu0 %vm1070_vm0, %v1071_v3 }
  0x88   :  { %888 = vmatprep.mubr.msk.f32.mxu1 %vm1070_vm0, %v1071_v3 }
  0x8a   :  { %800 = vmatmul.mubr.f32.gmra.mrb[22].mxu0 %v191_v44 }
  0x8b   :  { %889 = vmatmul.mubr.f32.gmra.mrb[22].mxu1 %v370_v45  ;;  %802 = vmatprep.mubr.msk.f32.mxu0 %vm1070_vm0, %v1071_v3 }
  0x8c   :  { %891 = vmatprep.mubr.msk.f32.mxu1 %vm1070_vm0, %v1071_v3 }
  0x8e   :  { %803 = vmatmul.mubr.f32.gmra.mrb[24].mxu0 %v192_v46 }
  0x8f   :  { %892 = vmatmul.mubr.f32.gmra.mrb[24].mxu1 %v371_v47  ;;  %805 = vmatprep.mubr.msk.f32.mxu0 %vm1070_vm0, %v1071_v3 }
  0x90   :  { %894 = vmatprep.mubr.msk.f32.mxu1 %vm1070_vm0, %v1071_v3 }
  0x92   :  { %806 = vmatmul.mubr.f32.gmra.mrb[26].mxu0 %v193_v48 }
  0x93   :  { %895 = vmatmul.mubr.f32.gmra.mrb[26].mxu1 %v372_v49  ;;  %808 = vmatprep.mubr.msk.f32.mxu0 %vm1070_vm0, %v1071_v3 }
  0x94   :  { %897 = vmatprep.mubr.msk.f32.mxu1 %vm1070_vm0, %v1071_v3 }
  0x96   :  { %809 = vmatmul.mubr.f32.gmra.mrb[28].mxu0 %v194_v50 }
  0x97   :  { %898 = vmatmul.mubr.f32.gmra.mrb[28].mxu1 %v373_v51  ;;  %811 = vmatprep.mubr.msk.f32.mxu0 %vm1070_vm0, %v1071_v3 }
  0x98   :  { %900 = vmatprep.mubr.msk.f32.mxu1 %vm1070_vm0, %v1071_v3 }
  0x9a   :  { %812 = vmatmul.mubr.f32.gmra.mrb[30].mxu0 %v195_v52 }
  0x9b   :  { %901 = vmatmul.mubr.f32.gmra.mrb[30].mxu1 %v374_v53  ;;  %814 = vmatprep.mubr.msk.f32.mxu0 %vm1070_vm0, %v1071_v3 }
  0x9c   :  { %903 = vmatprep.mubr.msk.f32.mxu1 %vm1070_vm0, %v1071_v3 }
  0x9e   :  { %815 = vmatmul.mubr.f32.gmra.mrb[32].mxu0 %v196_v54 }
  0x9f   :  { %904 = vmatmul.mubr.f32.gmra.mrb[32].mxu1 %v375_v55  ;;  %817 = vmatprep.mubr.msk.f32.mxu0 %vm1070_vm0, %v1071_v3 }
  0xa0   :  { %906 = vmatprep.mubr.msk.f32.mxu1 %vm1070_vm0, %v1071_v3 }
  0xa2   :  { %818 = vmatmul.mubr.f32.gmra.mrb[34].mxu0 %v197_v56 }
  0xa3   :  { %907 = vmatmul.mubr.f32.gmra.mrb[34].mxu1 %v376_v57  ;;  %820 = vmatprep.mubr.msk.f32.mxu0 %vm1070_vm0, %v1071_v3 }
  0xa4   :  { %909 = vmatprep.mubr.msk.f32.mxu1 %vm1070_vm0, %v1071_v3 }
  0xa6   :  { %821 = vmatmul.mubr.f32.gmra.mrb[36].mxu0 %v198_v58 }
  0xa7   :  { %910 = vmatmul.mubr.f32.gmra.mrb[36].mxu1 %v377_v59 }
 0x131   :  { %v265_v60 = vpop.f32.mrb[0].mxu0 }
 0x132   :  { %v444_v61 = vpop.f32.mrb[0].mxu1  ;;  %v768_v62 = vpop.f32.mrb[1].mxu0 }
 0x133   :  { %v538_v63 = vmul.f32 %v444_v61, %v265_v60  ;;  %v857_v0 = vpop.f32.mrb[1].mxu1 }
 0x135   :  { %v270_v1 = vpop.f32.mrb[2].mxu0 }
 0x136   :  { %v449_v2 = vpop.f32.mrb[2].mxu1  ;;  %v771_v4 = vpop.f32.mrb[3].mxu0 }
 0x137   :  { %v539_v5 = vmul.f32 %v449_v2, %v270_v1  ;;  %v860_v6 = vpop.f32.mrb[3].mxu1 }
 0x139   :  { %v557_v7 = vadd.f32 %v539_v5, %v538_v63  ;;  %v275_v8 = vpop.f32.mrb[4].mxu0 }
 0x13a   :  { %v454_v9 = vpop.f32.mrb[4].mxu1  ;;  %v774_v10 = vpop.f32.mrb[5].mxu0 }
 0x13b   :  { %v540_v11 = vmul.f32 %v454_v9, %v275_v8  ;;  %v863_v12 = vpop.f32.mrb[5].mxu1 }
 0x13d   :  { %v558_v3 = vadd.f32 %v557_v7, %v540_v11  ;;  %v280_v13 = vpop.f32.mrb[6].mxu0 }
 0x13e   :  { %v459_v14 = vpop.f32.mrb[6].mxu1  ;;  %v777_v15 = vpop.f32.mrb[7].mxu0 }
 0x13f   :  { %v541_v16 = vmul.f32 %v459_v14, %v280_v13  ;;  %v866_v17 = vpop.f32.mrb[7].mxu1 }
 0x141   :  { %v559_v18 = vadd.f32 %v558_v3, %v541_v16  ;;  %v285_v19 = vpop.f32.mrb[8].mxu0 }
 0x142   :  { %v464_v20 = vpop.f32.mrb[8].mxu1  ;;  %v780_v21 = vpop.f32.mrb[9].mxu0 }
 0x143   :  { %v542_v22 = vmul.f32 %v464_v20, %v285_v19  ;;  %v869_v23 = vpop.f32.mrb[9].mxu1 }
 0x145   :  { %v560_v24 = vadd.f32 %v559_v18, %v542_v22  ;;  %v290_v25 = vpop.f32.mrb[10].mxu0 }
 0x146   :  { %v469_v26 = vpop.f32.mrb[10].mxu1  ;;  %v783_v27 = vpop.f32.mrb[11].mxu0 }
 0x147   :  { %v543_v28 = vmul.f32 %v469_v26, %v290_v25  ;;  %v872_v29 = vpop.f32.mrb[11].mxu1 }
 0x149   :  { %v561_v30 = vadd.f32 %v560_v24, %v543_v28  ;;  %v295_v31 = vpop.f32.mrb[12].mxu0 }
 0x14a   :  { %v474_v32 = vpop.f32.mrb[12].mxu1  ;;  %v786_v33 = vpop.f32.mrb[13].mxu0 }
 0x14b   :  { %v544_v34 = vmul.f32 %v474_v32, %v295_v31  ;;  %v875_v35 = vpop.f32.mrb[13].mxu1 }
 0x14d   :  { %v562_v36 = vadd.f32 %v561_v30, %v544_v34  ;;  %v300_v37 = vpop.f32.mrb[14].mxu0 }
 0x14e   :  { %v479_v38 = vpop.f32.mrb[14].mxu1  ;;  %v789_v39 = vpop.f32.mrb[15].mxu0 }
 0x14f   :  { %v545_v40 = vmul.f32 %v479_v38, %v300_v37  ;;  %v878_v41 = vpop.f32.mrb[15].mxu1 }
 0x151   :  { %v563_v42 = vadd.f32 %v562_v36, %v545_v40  ;;  %v305_v43 = vpop.f32.mrb[16].mxu0 }
 0x152   :  { %v484_v44 = vpop.f32.mrb[16].mxu1  ;;  %v792_v45 = vpop.f32.mrb[17].mxu0 }
 0x153   :  { %v546_v46 = vmul.f32 %v484_v44, %v305_v43  ;;  %v881_v47 = vpop.f32.mrb[17].mxu1 }
 0x155   :  { %v564_v48 = vadd.f32 %v563_v42, %v546_v46  ;;  %v310_v49 = vpop.f32.mrb[18].mxu0 }
 0x156   :  { %v489_v50 = vpop.f32.mrb[18].mxu1  ;;  %v795_v51 = vpop.f32.mrb[19].mxu0 }
 0x157   :  { %v547_v52 = vmul.f32 %v489_v50, %v310_v49  ;;  %v884_v53 = vpop.f32.mrb[19].mxu1 }
 0x159   :  { %v565_v54 = vadd.f32 %v564_v48, %v547_v52  ;;  %v315_v55 = vpop.f32.mrb[20].mxu0 }
 0x15a   :  { %v494_v56 = vpop.f32.mrb[20].mxu1  ;;  %v798_v57 = vpop.f32.mrb[21].mxu0 }
 0x15b   :  { %v548_v58 = vmul.f32 %v494_v56, %v315_v55  ;;  %v887_v59 = vpop.f32.mrb[21].mxu1 }
 0x15d   :  { %v566_v60 = vadd.f32 %v565_v54, %v548_v58  ;;  %v320_v61 = vpop.f32.mrb[22].mxu0 }
 0x15e   :  { %v499_v62 = vpop.f32.mrb[22].mxu1  ;;  %v801_v63 = vpop.f32.mrb[23].mxu0 }
 0x15f   :  { %v549_v0 = vmul.f32 %v499_v62, %v320_v61  ;;  %v890_v1 = vpop.f32.mrb[23].mxu1 }
 0x161   :  { %v567_v2 = vadd.f32 %v566_v60, %v549_v0  ;;  %v325_v4 = vpop.f32.mrb[24].mxu0 }
 0x162   :  { %v504_v5 = vpop.f32.mrb[24].mxu1  ;;  %v804_v6 = vpop.f32.mrb[25].mxu0 }
 0x163   :  { %v550_v7 = vmul.f32 %v504_v5, %v325_v4  ;;  %v893_v8 = vpop.f32.mrb[25].mxu1 }
 0x165   :  { %v568_v9 = vadd.f32 %v567_v2, %v550_v7  ;;  %v330_v10 = vpop.f32.mrb[26].mxu0 }
 0x166   :  { %v509_v11 = vpop.f32.mrb[26].mxu1  ;;  %v807_v12 = vpop.f32.mrb[27].mxu0 }
 0x167   :  { %v551_v3 = vmul.f32 %v509_v11, %v330_v10  ;;  %v896_v13 = vpop.f32.mrb[27].mxu1 }
 0x169   :  { %v569_v14 = vadd.f32 %v568_v9, %v551_v3  ;;  %v335_v15 = vpop.f32.mrb[28].mxu0 }
 0x16a   :  { %v514_v16 = vpop.f32.mrb[28].mxu1  ;;  %v810_v17 = vpop.f32.mrb[29].mxu0 }
 0x16b   :  { %v552_v18 = vmul.f32 %v514_v16, %v335_v15  ;;  %v899_v19 = vpop.f32.mrb[29].mxu1 }
 0x16d   :  { %v570_v20 = vadd.f32 %v569_v14, %v552_v18  ;;  %v340_v21 = vpop.f32.mrb[30].mxu0 }
 0x16e   :  { %v519_v22 = vpop.f32.mrb[30].mxu1  ;;  %v813_v23 = vpop.f32.mrb[31].mxu0 }
 0x16f   :  { %v553_v24 = vmul.f32 %v519_v22, %v340_v21  ;;  %v902_v25 = vpop.f32.mrb[31].mxu1 }
 0x171   :  { %v571_v26 = vadd.f32 %v570_v20, %v553_v24  ;;  %v345_v27 = vpop.f32.mrb[32].mxu0 }
 0x172   :  { %v524_v28 = vpop.f32.mrb[32].mxu1  ;;  %v816_v29 = vpop.f32.mrb[33].mxu0 }
 0x173   :  { %v554_v30 = vmul.f32 %v524_v28, %v345_v27  ;;  %v905_v31 = vpop.f32.mrb[33].mxu1 }
 0x175   :  { %v572_v32 = vadd.f32 %v571_v26, %v554_v30  ;;  %v350_v33 = vpop.f32.mrb[34].mxu0 }
 0x176   :  { %v529_v34 = vpop.f32.mrb[34].mxu1  ;;  %v819_v35 = vpop.f32.mrb[35].mxu0 }
 0x177   :  { %v555_v36 = vmul.f32 %v529_v34, %v350_v33  ;;  %v908_v37 = vpop.f32.mrb[35].mxu1 }
 0x179   :  { %v573_v38 = vadd.f32 %v572_v32, %v555_v36  ;;  %v355_v39 = vpop.f32.mrb[36].mxu0 }
 0x17a   :  { %v534_v40 = vpop.f32.mrb[36].mxu1  ;;  %v822_v41 = vpop.f32.mrb[37].mxu0 }
 0x17b   :  { %v556_v42 = vmul.f32 %v534_v40, %v355_v39  ;;  %v911_v43 = vpop.f32.mrb[37].mxu1 }
 0x17d   :  { %v574_v44 = vadd.f32 %v573_v38, %v556_v42 }
 0x17f   :  { %v575_v45 = vrot.slane %v574_v44, 4 }
 0x181   :  { %v576_v46 = vadd.f32 %v575_v45, %v574_v44 }
 0x183   :  { %v577_v47 = vrot.slane %v576_v46, 2 }
 0x185   :  { %v578_v48 = vadd.f32 %v577_v47, %v576_v46 }
 0x187   :  { %v579_v49 = vrot.slane %v578_v48, 1 }
 0x189   :  { %v580_v50 = vadd.f32 %v579_v49, %v578_v48 }
 0x18b   :  { %581 = vst [vmem:[#allocation8] sm:$0x1] %v580_v50 }
 0x18c   :  { %1047 = shalt.err (!%p1044_p0)
}
 0x18d   :  { %s1048_s6 = scalar_lea.hbm %s1323_s4, 16 }
 0x18e   :  { %p1049_p1 = scmp.ne.s32.totalorder %s1323_s4, %s1048_s6  ;;  %p1052_p2 = scmp.lt.u32.totalorder %s1048_s6, %s1323_s4 }
 0x190   :  { %p1054_p3 = pnand %p1052_p2, %p1049_p1 }
 0x192   :  { %1057 = shalt.err (!%p1054_p3)
}
 0x193   :  { %591 = dma.vmem_to_hbm [thread:$0]  %s589_s26, 16, %s1323_s4, [#allocation4]  }
 0x194   :  { %1062 = dma.done.wait [#allocation4], 16  }
 0x195   :  { %1063 = vsyncadd [#allocation4], 4294967280 }
 0x196   :  { %595 = vsyncpa [#allocation3], 1 }
 0x197   :  { %596 = vsyncpa [#allocation6], 1 }
 0x198   :  { %597 = vsyncpa [#allocation4], 1 }

</bundles_post_ra>
